<compile_context>
chip_gen: v5e
topology: v5e:2x2
jax: 0.10.0
libtpu: 0.0.40
codegen_flags: <defaults>
</compile_context>

<pallas_src>
import functools
import math

import jax
import jax.numpy as jnp
from jax.experimental import pallas as pl
from jax.experimental.pallas import tpu as pltpu


# Double-buffered working-set budget and default scoped-VMEM limit (bytes).
# Sized conservatively for v7x's 64 MiB physical VMEM (32 MiB scoped default).
_VMEM_WORKING_SET_BUDGET = 16 * 1024 * 1024
_DEFAULT_VMEM_LIMIT = 32 * 1024 * 1024


def _concat_kernel(offsets, sizes, axis, *refs):
    """refs = (*in_refs, out_ref); copies each input tile into its slice."""
    in_refs = refs[:-1]
    out_ref = refs[-1]
    nd = len(out_ref.shape)
    for r, off, sz in zip(in_refs, offsets, sizes):
        idx = [slice(None)] * nd
        idx[axis] = slice(off, off + sz)  # static python ints -> static slice
        out_ref[tuple(idx)] = r[...].astype(out_ref.dtype)


def _round_down(x, m):
    return (x // m) * m


def concatenate(inputs, dim=1):
    """Pallas equivalent of torch.cat(inputs, dim=dim)."""
    inputs = list(inputs)
    if not inputs:
        raise ValueError("need at least one input")
    ndim = inputs[0].ndim
    if dim < 0:
        dim += ndim
    if not 0 <= dim < ndim:
        raise ValueError(f"dim {dim} out of range for {ndim}-D inputs")

    base = inputs[0].shape
    for x in inputs:
        if x.ndim != ndim:
            raise ValueError("all inputs must have the same rank")
        for ax in range(ndim):
            if ax != dim and x.shape[ax] != base[ax]:
                raise ValueError("non-concat dims must match across inputs")

    out_dtype = jnp.result_type(*[x.dtype for x in inputs])
    out_itemsize = jnp.dtype(out_dtype).itemsize
    c_sizes = [int(x.shape[dim]) for x in inputs]
    c_total = sum(c_sizes)
    offsets = []
    off = 0
    for s in c_sizes:
        offsets.append(off)
        off += s
    offsets = tuple(offsets)

    out_shape = tuple(c_total if ax == dim else base[ax] for ax in range(ndim))

    lead = int(math.prod(base[:dim])) if dim > 0 else 1
    trail = int(math.prod(base[dim + 1:])) if dim < ndim - 1 else 1

    budget = _VMEM_WORKING_SET_BUDGET // 2  # per buffer set (2x double buffer)

    if trail == 1:
        # Concat along the (flattened) last axis: 2D lane-axis concat.
        views = [x.reshape(lead, c) for x, c in zip(inputs, c_sizes)]
        per_row = sum(c * x.dtype.itemsize for x, c in zip(inputs, c_sizes))
        per_row += c_total * out_itemsize
        if lead <= 8:
            lead_tile = lead           # block dim == full dim is always legal
        else:
            lead_tile = min(lead, max(8, _round_down(budget // per_row, 8)))
            lead_tile = max(8, _round_down(lead_tile, 8))
        grid = (pl.cdiv(lead, lead_tile),)
        in_specs = [
            pl.BlockSpec((lead_tile, c), lambda i: (i, 0)) for c in c_sizes
        ]
        out_spec = pl.BlockSpec((lead_tile, c_total), lambda i: (i, 0))
        out_view_shape = (lead, c_total)
        dim_sem = ("parallel",)
        per_step_bytes = per_row * lead_tile
    else:
        # General case: 3D view (lead, C_i, trail); lane axis = trail.
        views = [x.reshape(lead, c, trail) for x, c in zip(inputs, c_sizes)]
        per_col = sum(c * x.dtype.itemsize for x, c in zip(inputs, c_sizes))
        per_col += c_total * out_itemsize
        if trail % 128 == 0:
            t_max = max(128, _round_down(budget // per_col, 128))
            trail_tile = min(trail, t_max)
            t = trail_tile               # prefer a divisor -> no ragged tiles
            while t > 128 and trail % t != 0:
                t -= 128
            trail_tile = t
        else:
            trail_tile = trail           # full dim satisfies the (8,128) rule
        lead_tile = min(lead, max(1, budget // (per_col * trail_tile)))
        grid = (pl.cdiv(lead, lead_tile), pl.cdiv(trail, trail_tile))
        in_specs = [
            pl.BlockSpec((lead_tile, c, trail_tile), lambda i, j: (i, 0, j))
            for c in c_sizes
        ]
        out_spec = pl.BlockSpec(
            (lead_tile, c_total, trail_tile), lambda i, j: (i, 0, j)
        )
        out_view_shape = (lead, c_total, trail)
        dim_sem = ("parallel", "parallel")
        per_step_bytes = per_col * lead_tile * trail_tile

    # Raise the scoped-VMEM limit if an oversized (unavoidable) block needs it.
    vmem_limit = int(max(_DEFAULT_VMEM_LIMIT, 2 * per_step_bytes + (4 << 20)))

    kernel = functools.partial(_concat_kernel, offsets, tuple(c_sizes), 1)

    out_view = pl.pallas_call(
        kernel,
        out_shape=jax.ShapeDtypeStruct(out_view_shape, out_dtype),
        grid=grid,
        in_specs=in_specs,
        out_specs=out_spec,
        compiler_params=pltpu.CompilerParams(
            dimension_semantics=dim_sem,
            vmem_limit_bytes=vmem_limit,
        ),
    )(*views)

    return out_view.reshape(out_shape)


if __name__ == "__main__":
    key = jax.random.PRNGKey(0)
    k1, k2, k3, k4, k5 = jax.random.split(key, 5)

    # NCHW inputs with different channel counts (concat along dim=1).
    x1 = jax.random.normal(k1, (2, 4, 16, 16), dtype=jnp.float32)
    x2 = jax.random.normal(k2, (2, 6, 16, 16), dtype=jnp.float32)
    x3 = jax.random.normal(k3, (2, 2, 16, 16), dtype=jnp.float32)

    out = concatenate([x1, x2, x3], dim=1)
    out = jax.block_until_ready(out)
    ref = jnp.concatenate([x1, x2, x3], axis=1)
    assert out.shape == (2, 12, 16, 16), out.shape
    assert jnp.array_equal(out, ref), "Pallas concat mismatch (dim=1)"

    # Last-axis concat exercises the 2D lane-axis path.
    y1 = jax.random.normal(k4, (8, 32), dtype=jnp.float32)
    y2 = jax.random.normal(k5, (8, 16), dtype=jnp.float32)
    out2 = jax.block_until_ready(concatenate([y1, y2], dim=-1))
    ref2 = jnp.concatenate([y1, y2], axis=-1)
    assert out2.shape == (8, 48), out2.shape
    assert jnp.array_equal(out2, ref2), "Pallas concat mismatch (dim=-1)"

    print("KERNEL_OK")
</pallas_src>

<mosaic_0001>
module attributes {stable_mosaic.version = 11 : i64} {
  func.func @_concat_kernel(%arg0: i32, %arg1: i32, %arg2: memref<2x4x256xf32, #tpu.memory_space<vmem>>, %arg3: memref<2x6x256xf32, #tpu.memory_space<vmem>>, %arg4: memref<2x2x256xf32, #tpu.memory_space<vmem>>, %arg5: memref<2x12x256xf32, #tpu.memory_space<vmem>>) attributes {dimension_semantics = [#tpu.dimension_semantics<parallel>, #tpu.dimension_semantics<parallel>], iteration_bounds = array<i64: 1, 1>, scalar_prefetch = 0 : i64, scratch_operands = 0 : i64, tpu.core_type = #tpu.core_type<tc>, window_params = [{transform_indices = @transform_0, window_bounds = array<i64: 2, 4, 256>}, {transform_indices = @transform_1, window_bounds = array<i64: 2, 6, 256>}, {transform_indices = @transform_2, window_bounds = array<i64: 2, 2, 256>}, {transform_indices = @transform_3, window_bounds = array<i64: 2, 12, 256>}]} {
    %c0 = arith.constant 0 : index
    %c0_0 = arith.constant 0 : index
    %c0_1 = arith.constant 0 : index
    %0 = vector.load %arg2[%c0, %c0_0, %c0_1] : memref<2x4x256xf32, #tpu.memory_space<vmem>>, vector<2x4x256xf32>
    %c0_2 = arith.constant 0 : index
    %c0_3 = arith.constant 0 : index
    %c0_4 = arith.constant 0 : index
    %1 = vector.load %arg5[%c0_2, %c0_3, %c0_4] : memref<2x12x256xf32, #tpu.memory_space<vmem>>, vector<2x4x256xf32>
    tpu.vector_store %arg5[%c0_2, %c0_3, %c0_4], %0 {strides = array<i32>} : memref<2x12x256xf32, #tpu.memory_space<vmem>>, vector<2x4x256xf32>,
    %c0_5 = arith.constant 0 : index
    %c0_6 = arith.constant 0 : index
    %c0_7 = arith.constant 0 : index
    %2 = vector.load %arg3[%c0_5, %c0_6, %c0_7] : memref<2x6x256xf32, #tpu.memory_space<vmem>>, vector<2x6x256xf32>
    %c0_8 = arith.constant 0 : index
    %c4 = arith.constant 4 : index
    %c0_9 = arith.constant 0 : index
    %3 = vector.load %arg5[%c0_8, %c4, %c0_9] : memref<2x12x256xf32, #tpu.memory_space<vmem>>, vector<2x6x256xf32>
    tpu.vector_store %arg5[%c0_8, %c4, %c0_9], %2 {strides = array<i32>} : memref<2x12x256xf32, #tpu.memory_space<vmem>>, vector<2x6x256xf32>,
    %c0_10 = arith.constant 0 : index
    %c0_11 = arith.constant 0 : index
    %c0_12 = arith.constant 0 : index
    %4 = vector.load %arg4[%c0_10, %c0_11, %c0_12] : memref<2x2x256xf32, #tpu.memory_space<vmem>>, vector<2x2x256xf32>
    %c0_13 = arith.constant 0 : index
    %c10 = arith.constant 10 : index
    %c0_14 = arith.constant 0 : index
    %5 = vector.load %arg5[%c0_13, %c10, %c0_14] : memref<2x12x256xf32, #tpu.memory_space<vmem>>, vector<2x2x256xf32>
    tpu.vector_store %arg5[%c0_13, %c10, %c0_14], %4 {strides = array<i32>} : memref<2x12x256xf32, #tpu.memory_space<vmem>>, vector<2x2x256xf32>,
    return
  }
  func.func @transform_0(%arg0: i32, %arg1: i32) -> (i32, i32, i32) {
    %c0_i32 = arith.constant 0 : i32
    %c0_i32_0 = arith.constant 0 : i32
    return %arg0, %c0_i32, %arg1 : i32, i32, i32
  }
  func.func @transform_1(%arg0: i32, %arg1: i32) -> (i32, i32, i32) {
    %c0_i32 = arith.constant 0 : i32
    %c0_i32_0 = arith.constant 0 : i32
    return %arg0, %c0_i32, %arg1 : i32, i32, i32
  }
  func.func @transform_2(%arg0: i32, %arg1: i32) -> (i32, i32, i32) {
    %c0_i32 = arith.constant 0 : i32
    %c0_i32_0 = arith.constant 0 : i32
    return %arg0, %c0_i32, %arg1 : i32, i32, i32
  }
  func.func @transform_3(%arg0: i32, %arg1: i32) -> (i32, i32, i32) {
    %c0_i32 = arith.constant 0 : i32
    %c0_i32_0 = arith.constant 0 : i32
    return %arg0, %c0_i32, %arg1 : i32, i32, i32
  }
}

</mosaic_0001>

<bundles_post_ra>
// kernel: tpu_custom_call.1
= control target key start
LH: loop header
LB: loop body
LE: loop exit
PB: predicated region body
PF: predicated region fallthrough
CT: control target
= control target key end

     0   :  { %s173_s0 = inlined_call_operand.vmem [shape: f32[2,4,256], index: 0, kind: input, shape index: {}]   ;;  %s174_s2 = inlined_call_operand.vmem [shape: f32[2,2,256], index: 2, kind: input, shape index: {}]   ;;  %s175_s1 = inlined_call_operand.vmem [shape: f32[2,6,256], index: 1, kind: input, shape index: {}]   ;;  %s176_s3 = inlined_call_operand.vmem [shape: f32[2,12,256], index: 3, kind: output, shape index: {}]  }
   0x1   :  { %v14_v0 = vld [vmem:[%s173_s0] sm:$0xff]  ;;  %v15_v1 = vld [vmem:[%s173_s0 + $0x8] sm:$0xff]  ;;  %v35_v7 = vld [vmem:[%s175_s1 + $0x10] sm:$0x3f] }
   0x2   :  { %18 = vst [vmem:[#allocation1] ss:$2 sm:$0xff] %v14_v0  ;;  %v58_v2 = vld [vmem:[%s174_s2 + $0x4] sm:$0xf]  ;;  %v34_v5 = vld [vmem:[%s175_s1 + $0x8] sm:$0x3f] }
   0x3   :  { %v33_v3 = vld [vmem:[%s175_s1] sm:$0x3f]  ;;  %22 = vst [vmem:[#allocation1 + $0x10] ss:$2 sm:$0xff] %v15_v1  ;;  %v42_v6 = vrot.slane %v34_v5, 4  ;;  %v43_v14 = vrot.slane %v35_v7, 4 }
   0x4   :  { %v41_v4 = vrot.slane %v33_v3, 4  ;;  %66 = vst [vmem:[#allocation1 + $0x21] ss:$4 sm:$0xff] %v58_v2  ;;  %v57_v10 = vld [vmem:[%s174_s2] sm:$0xf] }
   0x5   :  { %50 = vst [vmem:[%s176_s3 + $0x8] sm:$0xf0] %v42_v6  ;;  %v36_v12 = vld [vmem:[%s175_s1 + $0x18] sm:$0x3f] }
   0x6   :  { %49 = vst [vmem:[%s176_s3] sm:$0xf0] %v41_v4  ;;  %v44_v15 = vrot.slane %v36_v12, 4 }
   0x7   :  { %51 = vst [vmem:[%s176_s3 + $0x10] sm:$0x3] %v41_v4 }
   0x8   :  { %52 = vst [vmem:[%s176_s3 + $0x18] sm:$0x3] %v42_v6 }
   0x9   :  { %v19_v8 = vld.sshfl [vmem:[#allocation1] sm:$0xff pattern:$0x75316420]  ;;  %v20_v9 = vld.sshfl [vmem:[#allocation1 + $0x8] sm:$0xff pattern:$0x75316420] }
   0xa   :  { %29 = vst [vmem:[%s176_s3] sm:$0xf] %v19_v8  ;;  %v23_v11 = vld.sshfl [vmem:[#allocation1 + $0x10] sm:$0xff pattern:$0x75316420] }
   0xb   :  { %30 = vst [vmem:[%s176_s3 + $0x8] sm:$0xf] %v20_v9  ;;  %v24_v13 = vld.sshfl [vmem:[#allocation1 + $0x18] sm:$0xff pattern:$0x75316420] }
   0xc   :  { %31 = vst [vmem:[%s176_s3 + $0x20] sm:$0xf] %v23_v11  ;;  %v67_v16 = vld.sshfl [vmem:[#allocation1 + $0x20] sm:$0xff pattern:$0x73625140] }
   0xd   :  { %32 = vst [vmem:[%s176_s3 + $0x28] sm:$0xf] %v24_v13  ;;  %v68_v17 = vld.sshfl [vmem:[#allocation1 + $0x28] sm:$0xff pattern:$0x73625140] }
   0xe   :  { %62 = vst [vmem:[#allocation1 + $0x1] ss:$4 sm:$0xff] %v57_v10 }
   0xf   :  { %53 = vst [vmem:[%s176_s3 + $0x20] sm:$0xf0] %v43_v14 }
  0x10   :  { %55 = vst [vmem:[%s176_s3 + $0x30] sm:$0x3] %v43_v14 }
  0x11   :  { %54 = vst [vmem:[%s176_s3 + $0x28] sm:$0xf0] %v44_v15 }
  0x12   :  { %56 = vst [vmem:[%s176_s3 + $0x38] sm:$0x3] %v44_v15 }
  0x13   :  { %75 = vst [vmem:[%s176_s3 + $0x30] sm:$0xc] %v67_v16 }
  0x14   :  { %76 = vst [vmem:[%s176_s3 + $0x38] sm:$0xc] %v68_v17 }
  0x15   :  { %v63_v18 = vld.sshfl [vmem:[#allocation1] sm:$0xff pattern:$0x73625140]  ;;  %v64_v19 = vld.sshfl [vmem:[#allocation1 + $0x8] sm:$0xff pattern:$0x73625140] }
  0x16   :  { %73 = vst [vmem:[%s176_s3 + $0x10] sm:$0xc] %v63_v18 }
  0x17   :  { %74 = vst [vmem:[%s176_s3 + $0x18] sm:$0xc] %v64_v19 }

</bundles_post_ra>
